<compile_context>
chip_gen: v5e
topology: v5e:2x2
jax: 0.10.0
libtpu: 0.0.40
codegen_flags: <defaults>
</compile_context>

<pallas_src>
import functools

import jax
import jax.numpy as jnp
from jax.experimental import pallas as pl
from jax.experimental.pallas import tpu as pltpu


def _round_up(x, m):
    return (x + m - 1) // m * m


def _cdiv(a, b):
    return -(-a // b)


def _fit_tiles(total, target, align):
    """Tile size (multiple of `align`, <= target) that splits the aligned total
    into near-equal tiles with minimal padding.  Returns (tile, padded_total)."""
    total_a = _round_up(max(total, 1), align)
    target = max(align, min(_round_up(target, align), total_a))
    n = _cdiv(total_a, target)
    tile = _round_up(_cdiv(total_a, n), align)
    return tile, n * tile


def _vmem_budget_bytes():
    # Generation-aware budget: 75% of physical VMEM (v5e/v6e: 128 MiB/core,
    # v7x: 64 MiB/core).  Conservative fallback = v7x size.
    cap = 64 * 1024 * 1024
    try:
        cap = int(pltpu.get_tpu_info().vmem_capacity_bytes)
    except Exception:
        pass
    return (cap * 3) // 4


def _ffn_fused_kernel(x_ref, w1_ref, b1_ref, w2_ref, b2_ref, o_ref):
    # Weights-resident path: W1/W2 blocks have constant index -> fetched once.
    h = jnp.dot(x_ref[...], w1_ref[...], preferred_element_type=jnp.float32)
    h = jnp.maximum(h + b1_ref[...], 0.0)          # bias + ReLU in f32
    out = jnp.dot(h.astype(w2_ref.dtype), w2_ref[...],
                  preferred_element_type=jnp.float32)
    o_ref[...] = (out + b2_ref[...]).astype(o_ref.dtype)


def _ffn_split_kernel(x_ref, w1_ref, b1_ref, w2_ref, b2_ref, o_ref, acc_ref):
    # Hidden-streamed path: hidden chunks on the last ("arbitrary") grid axis.
    j = pl.program_id(1)
    h = jnp.dot(x_ref[...], w1_ref[...], preferred_element_type=jnp.float32)
    h = jnp.maximum(h + b1_ref[...], 0.0)
    part = jnp.dot(h.astype(w2_ref.dtype), w2_ref[...],
                   preferred_element_type=jnp.float32)

    @pl.when(j == 0)
    def _first():            # direct store: no separate zero-init pass
        acc_ref[...] = part

    @pl.when(j > 0)
    def _accum():
        acc_ref[...] += part

    @pl.when(j == pl.num_programs(1) - 1)
    def _finalize():
        o_ref[...] = (acc_ref[...] + b2_ref[...]).astype(o_ref.dtype)


@functools.partial(
    jax.jit,
    static_argnames=("tm", "tn", "compute_dtype", "out_dtype", "force_split"))
def feed_forward(x, w1, b1, w2, b2, *, tm=None, tn=None,
                 compute_dtype=jnp.bfloat16, out_dtype=None, force_split=False):
    """relu(x @ W1 + b1) @ W2 + b2 (Dropout = identity / eval mode).

    x: (B, T, C); w1: (C, 4C); b1: (4C,); w2: (4C, C); b2: (C,).
    """
    B, T, C = x.shape
    H = w1.shape[1]  # 4*C
    M = B * T

    out_dtype = x.dtype if out_dtype is None else out_dtype
    cdt = jnp.dtype(compute_dtype)
    odt = jnp.dtype(out_dtype)
    budget = _vmem_budget_bytes()

    # Default tile targets: larger row tile when VMEM is plentiful (v5e/v6e).
    if tm is None:
        tm = 1024 if budget >= 90 * 1024 * 1024 else 512
    if tn is None:
        tn = 1024

    C_p = _round_up(C, 128)       # lane-dense feature dim
    H_full = _round_up(H, 128)

    # Row tile: prefer >= 2 row tiles when rows are plentiful so the
    # "parallel" axis shards across v7x's two TensorCores.
    tm_target = tm
    if M >= 512:
        tm_target = min(tm, _round_up(_cdiv(M, 2), 256))
    tm_eff, M_p = _fit_tiles(M, tm_target, 8)

    def fused_bytes(tm_):
        return (2 * tm_ * C_p * cdt.itemsize              # x (double-buffered)
                + 2 * C_p * H_full * cdt.itemsize          # W1
                + 2 * H_full * C_p * cdt.itemsize          # W2
                + 2 * 8 * H_full * 4 + 2 * 8 * C_p * 4     # biases (sublane pad)
                + 2 * tm_ * C_p * odt.itemsize             # out
                + tm_ * H_full * 4)                        # f32 hidden temp

    def split_bytes(tm_, tn_):
        return (2 * tm_ * C_p * cdt.itemsize
                + 2 * C_p * tn_ * cdt.itemsize
                + 2 * tn_ * C_p * cdt.itemsize
                + 2 * 8 * tn_ * 4 + 2 * 8 * C_p * 4
                + 2 * tm_ * C_p * odt.itemsize
                + tm_ * C_p * 4                            # f32 acc scratch
                + tm_ * tn_ * 4)                           # f32 hidden chunk

    use_fused = (not force_split) and fused_bytes(tm_eff) <= budget

    if use_fused:
        tn_eff, H_p = H_full, H_full
    else:
        tn_eff, H_p = _fit_tiles(H, tn, 128)
        # Shrink tiles until the resident set fits this generation's VMEM.
        while (split_bytes(tm_eff, tn_eff) > budget
               and (tm_eff > 8 or tn_eff > 128)):
            if tn_eff >= tm_eff and tn_eff > 128:
                tn_eff, H_p = _fit_tiles(H, max(128, tn_eff // 2), 128)
            elif tm_eff > 8:
                tm_eff, M_p = _fit_tiles(M, max(8, tm_eff // 2), 8)
            else:
                break

    grid_m = M_p // tm_eff

    # --- prepare operands (cast + zero-pad to tile-aligned shapes) ---
    # NOTE: in a transformer loop, pre-cast / pre-pad the weights once outside
    # this call so the O(C*H) copy is not re-emitted per invocation.
    x2d = x.reshape(M, C).astype(compute_dtype)
    w1c = w1.astype(compute_dtype)
    w2c = w2.astype(compute_dtype)
    b1f = b1.astype(jnp.float32).reshape(1, H)
    b2f = b2.astype(jnp.float32).reshape(1, C)

    if (M_p, C_p) != (M, C):
        x2d = jnp.pad(x2d, ((0, M_p - M), (0, C_p - C)))
    if (C_p, H_p) != (C, H):
        w1c = jnp.pad(w1c, ((0, C_p - C), (0, H_p - H)))
    if (H_p, C_p) != (H, C):
        w2c = jnp.pad(w2c, ((0, H_p - H), (0, C_p - C)))
    if H_p != H:
        b1f = jnp.pad(b1f, ((0, 0), (0, H_p - H)))
    if C_p != C:
        b2f = jnp.pad(b2f, ((0, 0), (0, C_p - C)))

    weight_passes = 1 if use_fused else grid_m
    cost = pl.CostEstimate(
        flops=4 * M_p * C_p * H_p,                 # two matmuls
        transcendentals=0,
        bytes_accessed=int(M_p * C_p * cdt.itemsize               # x in
                           + M_p * C_p * odt.itemsize             # out
                           + weight_passes * 2 * C_p * H_p * cdt.itemsize
                           + (H_p + C_p) * 4),                    # biases
    )

    if use_fused:
        grid_spec = pltpu.PrefetchScalarGridSpec(
            num_scalar_prefetch=0,
            grid=(grid_m,),
            in_specs=[
                pl.BlockSpec((tm_eff, C_p), lambda i: (i, 0)),   # x row tile
                pl.BlockSpec((C_p, H_p), lambda i: (0, 0)),      # W1 (resident)
                pl.BlockSpec((1, H_p), lambda i: (0, 0)),        # b1
                pl.BlockSpec((H_p, C_p), lambda i: (0, 0)),      # W2 (resident)
                pl.BlockSpec((1, C_p), lambda i: (0, 0)),        # b2
            ],
            out_specs=pl.BlockSpec((tm_eff, C_p), lambda i: (i, 0)),
        )
        kernel = _ffn_fused_kernel
        dims = ("parallel",)
    else:
        grid_spec = pltpu.PrefetchScalarGridSpec(
            num_scalar_prefetch=0,
            grid=(grid_m, H_p // tn_eff),
            in_specs=[
                pl.BlockSpec((tm_eff, C_p), lambda i, j: (i, 0)),  # x rows
                pl.BlockSpec((C_p, tn_eff), lambda i, j: (0, j)),  # W1 cols
                pl.BlockSpec((1, tn_eff), lambda i, j: (0, j)),    # b1 chunk
                pl.BlockSpec((tn_eff, C_p), lambda i, j: (j, 0)),  # W2 rows
                pl.BlockSpec((1, C_p), lambda i, j: (0, 0)),       # b2
            ],
            out_specs=pl.BlockSpec((tm_eff, C_p), lambda i, j: (i, 0)),
            scratch_shapes=[pltpu.VMEM((tm_eff, C_p), jnp.float32)],
        )
        kernel = _ffn_split_kernel
        dims = ("parallel", "arbitrary")

    out2d = pl.pallas_call(
        kernel,
        out_shape=jax.ShapeDtypeStruct((M_p, C_p), out_dtype),
        grid_spec=grid_spec,
        compiler_params=pltpu.CompilerParams(
            dimension_semantics=dims,
            vmem_limit_bytes=int(budget),
        ),
        cost_estimate=cost,
    )(x2d, w1c, b1f, w2c, b2f)

    return out2d[:M, :C].reshape(B, T, C)


def init_params(key, n_embd):
    """Deterministic init matching nn.Linear shapes (uniform +-1/sqrt(fan_in))."""
    h = 4 * n_embd
    k1, k2, k3, k4 = jax.random.split(key, 4)
    lim1 = 1.0 / jnp.sqrt(n_embd)
    lim2 = 1.0 / jnp.sqrt(h)
    # Stored as (in_features, out_features): y = x @ W + b
    w1 = jax.random.uniform(k1, (n_embd, h), jnp.float32, -lim1, lim1)
    b1 = jax.random.uniform(k2, (h,), jnp.float32, -lim1, lim1)
    w2 = jax.random.uniform(k3, (h, n_embd), jnp.float32, -lim2, lim2)
    b2 = jax.random.uniform(k4, (n_embd,), jnp.float32, -lim2, lim2)
    return w1, b1, w2, b2


if __name__ == "__main__":
    key = jax.random.PRNGKey(0)
    kx, kp = jax.random.split(key)

    # Primary test: lane-aligned width (C multiple of 128) -> fused path.
    B, T, n_embd = 2, 8, 128
    x = jax.random.normal(kx, (B, T, n_embd), jnp.float32)
    w1, b1, w2, b2 = init_params(kp, n_embd)

    ref = (jnp.maximum(x.reshape(-1, n_embd) @ w1 + b1, 0.0) @ w2 + b2)
    ref = ref.reshape(B, T, n_embd)

    # bf16 compute path (default).
    out_bf16 = jax.block_until_ready(feed_forward(x, w1, b1, w2, b2))
    assert out_bf16.shape == (B, T, n_embd)
    assert jnp.allclose(out_bf16, ref, atol=3e-2, rtol=3e-2)

    # f32 compute path, tight tolerance.
    out_f32 = jax.block_until_ready(
        feed_forward(x, w1, b1, w2, b2, compute_dtype=jnp.float32))
    assert jnp.allclose(out_f32, ref, atol=1e-5, rtol=1e-5)

    # Explicitly exercise the hidden-streamed (split/accumulator) path.
    out_split = jax.block_until_ready(
        feed_forward(x, w1, b1, w2, b2, compute_dtype=jnp.float32,
                     tn=128, force_split=True))
    assert jnp.allclose(out_split, ref, atol=1e-5, rtol=1e-5)

    # Ragged / unaligned shapes exercise the wrapper padding path
    # (M=14 not multiple of 8, C=96 not multiple of 128, H=384).
    B2, T2, C2 = 2, 7, 96
    x2 = jax.random.normal(kx, (B2, T2, C2), jnp.float32)
    w1b, b1b, w2b, b2b = init_params(kp, C2)
    ref2 = (jnp.maximum(x2.reshape(-1, C2) @ w1b + b1b, 0.0) @ w2b + b2b)
    ref2 = ref2.reshape(B2, T2, C2)
    out2 = jax.block_until_ready(
        feed_forward(x2, w1b, b1b, w2b, b2b, compute_dtype=jnp.float32))
    assert jnp.allclose(out2, ref2, atol=1e-5, rtol=1e-5)

    print("KERNEL_OK")
</pallas_src>

<mosaic_0001>
module attributes {stable_mosaic.version = 11 : i64} {
  func.func @_ffn_fused_kernel(%arg0: i32, %arg1: memref<16x128xbf16, #tpu.memory_space<vmem>>, %arg2: memref<128x512xbf16, #tpu.memory_space<vmem>>, %arg3: memref<1x512xf32, #tpu.memory_space<vmem>>, %arg4: memref<512x128xbf16, #tpu.memory_space<vmem>>, %arg5: memref<1x128xf32, #tpu.memory_space<vmem>>, %arg6: memref<16x128xf32, #tpu.memory_space<vmem>>) attributes {dimension_semantics = [#tpu.dimension_semantics<parallel>], iteration_bounds = array<i64: 1>, scalar_prefetch = 0 : i64, scratch_operands = 0 : i64, tpu.core_type = #tpu.core_type<tc>, window_params = [{transform_indices = @transform_0, window_bounds = array<i64: 16, 128>}, {pipeline_mode = #tpu.pipeline_mode<synchronous>, transform_indices = @transform_1, window_bounds = array<i64: 128, 512>}, {pipeline_mode = #tpu.pipeline_mode<synchronous>, transform_indices = @transform_2, window_bounds = array<i64: 1, 512>}, {pipeline_mode = #tpu.pipeline_mode<synchronous>, transform_indices = @transform_3, window_bounds = array<i64: 512, 128>}, {pipeline_mode = #tpu.pipeline_mode<synchronous>, transform_indices = @transform_4, window_bounds = array<i64: 1, 128>}, {transform_indices = @transform_5, window_bounds = array<i64: 16, 128>}]} {
    %c0 = arith.constant 0 : index
    %c0_0 = arith.constant 0 : index
    %0 = vector.load %arg1[%c0, %c0_0] : memref<16x128xbf16, #tpu.memory_space<vmem>>, vector<16x128xbf16>
    %c0_1 = arith.constant 0 : index
    %c0_2 = arith.constant 0 : index
    %1 = vector.load %arg2[%c0_1, %c0_2] : memref<128x512xbf16, #tpu.memory_space<vmem>>, vector<128x512xbf16>
    %cst = arith.constant dense<0.000000e+00> : vector<16x512xf32>
    %2 = tpu.matmul %0, %1, %cst {dimension_numbers = #tpu.dot_dimension_numbers<[1], [0], [0], [1], [0, 0, 1, 1], [], []>} : vector<16x128xbf16>, vector<128x512xbf16>, vector<16x512xf32> -> vector<16x512xf32>
    %c0_3 = arith.constant 0 : index
    %c0_4 = arith.constant 0 : index
    %3 = vector.load %arg3[%c0_3, %c0_4] : memref<1x512xf32, #tpu.memory_space<vmem>>, vector<1x512xf32>
    %4 = vector.broadcast %3 : vector<1x512xf32> to vector<16x512xf32>
    %5 = arith.addf %2, %4 : vector<16x512xf32>
    %cst_5 = arith.constant 0.000000e+00 : f32
    %6 = vector.broadcast %cst_5 : f32 to vector<16x512xf32>
    %7 = arith.maximumf %5, %6 : vector<16x512xf32>
    %8 = arith.truncf %7 : vector<16x512xf32> to vector<16x512xbf16>
    %c0_6 = arith.constant 0 : index
    %c0_7 = arith.constant 0 : index
    %9 = vector.load %arg4[%c0_6, %c0_7] : memref<512x128xbf16, #tpu.memory_space<vmem>>, vector<512x128xbf16>
    %cst_8 = arith.constant dense<0.000000e+00> : vector<16x128xf32>
    %10 = tpu.matmul %8, %9, %cst_8 {dimension_numbers = #tpu.dot_dimension_numbers<[1], [0], [0], [1], [0, 0, 1, 1], [], []>} : vector<16x512xbf16>, vector<512x128xbf16>, vector<16x128xf32> -> vector<16x128xf32>
    %c0_9 = arith.constant 0 : index
    %c0_10 = arith.constant 0 : index
    %11 = vector.load %arg5[%c0_9, %c0_10] : memref<1x128xf32, #tpu.memory_space<vmem>>, vector<1x128xf32>
    %12 = vector.broadcast %11 : vector<1x128xf32> to vector<16x128xf32>
    %13 = arith.addf %10, %12 : vector<16x128xf32>
    %c0_11 = arith.constant 0 : index
    %c0_12 = arith.constant 0 : index
    %14 = vector.load %arg6[%c0_11, %c0_12] : memref<16x128xf32, #tpu.memory_space<vmem>>, vector<16x128xf32>
    tpu.vector_store %arg6[%c0_11, %c0_12], %13 {strides = array<i32>} : memref<16x128xf32, #tpu.memory_space<vmem>>, vector<16x128xf32>,
    return
  }
  func.func @transform_0(%arg0: i32) -> (i32, i32) {
    %c0_i32 = arith.constant 0 : i32
    %c0_i32_0 = arith.constant 0 : i32
    return %arg0, %c0_i32 : i32, i32
  }
  func.func @transform_1(%arg0: i32) -> (i32, i32) {
    %c0_i32 = arith.constant 0 : i32
    %c0_i32_0 = arith.constant 0 : i32
    %c0_i32_1 = arith.constant 0 : i32
    return %c0_i32, %c0_i32_0 : i32, i32
  }
  func.func @transform_2(%arg0: i32) -> (i32, i32) {
    %c0_i32 = arith.constant 0 : i32
    %c0_i32_0 = arith.constant 0 : i32
    %c0_i32_1 = arith.constant 0 : i32
    return %c0_i32, %c0_i32_0 : i32, i32
  }
  func.func @transform_3(%arg0: i32) -> (i32, i32) {
    %c0_i32 = arith.constant 0 : i32
    %c0_i32_0 = arith.constant 0 : i32
    %c0_i32_1 = arith.constant 0 : i32
    return %c0_i32, %c0_i32_0 : i32, i32
  }
  func.func @transform_4(%arg0: i32) -> (i32, i32) {
    %c0_i32 = arith.constant 0 : i32
    %c0_i32_0 = arith.constant 0 : i32
    %c0_i32_1 = arith.constant 0 : i32
    return %c0_i32, %c0_i32_0 : i32, i32
  }
  func.func @transform_5(%arg0: i32) -> (i32, i32) {
    %c0_i32 = arith.constant 0 : i32
    %c0_i32_0 = arith.constant 0 : i32
    return %arg0, %c0_i32 : i32, i32
  }
}

</mosaic_0001>

<bundles_post_ra>
// kernel: feed_forward.1
= control target key start
LH: loop header
LB: loop body
LE: loop exit
PB: predicated region body
PF: predicated region fallthrough
CT: control target
= control target key end

     0   :  { %s1323_s0 = inlined_call_operand.vmem [shape: bf16[16,128], index: 0, kind: input, shape index: {}]   ;;  %s1324_s1 = inlined_call_operand.vmem [shape: bf16[128,512], index: 1, kind: input, shape index: {}]   ;;  %s1325_s2 = inlined_call_operand.vmem [shape: f32[1,512], index: 2, kind: input, shape index: {}]   ;;  %s1326_s3 = inlined_call_operand.vmem [shape: bf16[512,128], index: 3, kind: input, shape index: {}]   ;;  %s1327_s4 = inlined_call_operand.vmem [shape: f32[1,128], index: 4, kind: input, shape index: {}]   ;;  %s1328_s5 = inlined_call_operand.hbm [shape: f32[16,128], index: 5, kind: output, shape index: {}]  }
   0x1   :  { %v753_v0 = vld [vmem:[%s1324_s1 + $0xe0] sm:$0xf]  ;;  %v926_v1 = vld [vmem:[%s1324_s1 + $0xec] sm:$0xf0]  ;;  %v924_v2 = vld [vmem:[%s1324_s1 + $0xe4] sm:$0xf] }
   0x2   :  { %v754_v3 = vor.u32 %v926_v1, %v753_v0  ;;  %v755_v4 = vld [vmem:[%s1324_s1 + $0xf0] sm:$0xf0]  ;;  %v761_v5 = vld [vmem:[%s1324_s1 + $0xe8] sm:$0xf]  ;;  %v927_v6 = vld [vmem:[%s1324_s1 + $0xf4] sm:$0xf0] }
   0x3   :  { %v758_v7 = vor.u32 %v924_v2, %v755_v4  ;;  %v762_v8 = vor.u32 %v927_v6, %v761_v5  ;;  %v925_v9 = vld [vmem:[%s1324_s1 + $0xec] sm:$0xf]  ;;  %v763_v10 = vld [vmem:[%s1324_s1 + $0xf8] sm:$0xf0]  ;;  %v737_v11 = vld [vmem:[%s1324_s1 + $0xc0] sm:$0xf] }
   0x4   :  { %231 = vmatpush.bf16.msra.mxu0 %v754_v3  ;;  %v766_v12 = vor.u32 %v925_v9, %v763_v10  ;;  %v922_v13 = vld [vmem:[%s1324_s1 + $0xcc] sm:$0xf0]  ;;  %v920_v14 = vld [vmem:[%s1324_s1 + $0xc4] sm:$0xf]  ;;  %v739_v15 = vld [vmem:[%s1324_s1 + $0xd0] sm:$0xf0] }
   0x5   :  { %245 = vmatpush.bf16.msra.mxu1 %v758_v7  ;;  %259 = vmatpush.bf16.msra.mxu2 %v762_v8  ;;  %v738_v16 = vor.u32 %v922_v13, %v737_v11  ;;  %v742_v17 = vor.u32 %v920_v14, %v739_v15  ;;  %v745_v18 = vld [vmem:[%s1324_s1 + $0xc8] sm:$0xf]  ;;  %v923_v19 = vld [vmem:[%s1324_s1 + $0xd4] sm:$0xf0]  ;;  %v921_v20 = vld [vmem:[%s1324_s1 + $0xcc] sm:$0xf] }
   0x6   :  { %273 = vmatpush.bf16.msra.mxu3 %v766_v12  ;;  %v746_v21 = vor.u32 %v923_v19, %v745_v18  ;;  %v747_v22 = vld [vmem:[%s1324_s1 + $0xd8] sm:$0xf0]  ;;  %v721_v23 = vld [vmem:[%s1324_s1 + $0xa0] sm:$0xf]  ;;  %v918_v24 = vld [vmem:[%s1324_s1 + $0xac] sm:$0xf0] }
   0x7   :  { %v750_v25 = vor.u32 %v921_v20, %v747_v22  ;;  %v916_v26 = vld [vmem:[%s1324_s1 + $0xa4] sm:$0xf]  ;;  %v723_v27 = vld [vmem:[%s1324_s1 + $0xb0] sm:$0xf0]  ;;  %v729_v28 = vld [vmem:[%s1324_s1 + $0xa8] sm:$0xf]  ;;  %v722_v29 = vor.u32 %v918_v24, %v721_v23 }
   0x8   :  { %232 = vmatpush.bf16.msra.mxu0 %v738_v16  ;;  %v919_v30 = vld [vmem:[%s1324_s1 + $0xb4] sm:$0xf0]  ;;  %v917_v31 = vld [vmem:[%s1324_s1 + $0xac] sm:$0xf]  ;;  %v731_v32 = vld [vmem:[%s1324_s1 + $0xb8] sm:$0xf0]  ;;  %v726_v33 = vor.u32 %v916_v26, %v723_v27 }
   0x9   :  { %246 = vmatpush.bf16.msra.mxu1 %v742_v17  ;;  %260 = vmatpush.bf16.msra.mxu2 %v746_v21  ;;  %v730_v34 = vor.u32 %v919_v30, %v729_v28  ;;  %v705_v35 = vld [vmem:[%s1324_s1 + $0x80] sm:$0xf]  ;;  %v914_v36 = vld [vmem:[%s1324_s1 + $0x8c] sm:$0xf0]  ;;  %v912_v37 = vld [vmem:[%s1324_s1 + $0x84] sm:$0xf]  ;;  %v734_v38 = vor.u32 %v917_v31, %v731_v32 }
   0xa   :  { %274 = vmatpush.bf16.msra.mxu3 %v750_v25  ;;  %v707_v39 = vld [vmem:[%s1324_s1 + $0x90] sm:$0xf0]  ;;  %v713_v40 = vld [vmem:[%s1324_s1 + $0x88] sm:$0xf]  ;;  %v915_v41 = vld [vmem:[%s1324_s1 + $0x94] sm:$0xf0]  ;;  %v706_v44 = vor.u32 %v914_v36, %v705_v35 }
   0xb   :  { %v913_v42 = vld [vmem:[%s1324_s1 + $0x8c] sm:$0xf]  ;;  %v715_v43 = vld [vmem:[%s1324_s1 + $0x98] sm:$0xf0]  ;;  %v710_v45 = vor.u32 %v912_v37, %v707_v39  ;;  %v714_v46 = vor.u32 %v915_v41, %v713_v40  ;;  %v689_v47 = vld [vmem:[%s1324_s1 + $0x60] sm:$0xf] }
   0xc   :  { %233 = vmatpush.bf16.msra.mxu0 %v722_v29  ;;  %v910_v48 = vld [vmem:[%s1324_s1 + $0x6c] sm:$0xf0]  ;;  %v908_v49 = vld [vmem:[%s1324_s1 + $0x64] sm:$0xf]  ;;  %v718_v50 = vor.u32 %v913_v42, %v715_v43  ;;  %v691_v51 = vld [vmem:[%s1324_s1 + $0x70] sm:$0xf0] }
   0xd   :  { %247 = vmatpush.bf16.msra.mxu1 %v726_v33  ;;  %261 = vmatpush.bf16.msra.mxu2 %v730_v34  ;;  %v697_v52 = vld [vmem:[%s1324_s1 + $0x68] sm:$0xf]  ;;  %v911_v53 = vld [vmem:[%s1324_s1 + $0x74] sm:$0xf0]  ;;  %v909_v54 = vld [vmem:[%s1324_s1 + $0x6c] sm:$0xf]  ;;  %v690_v56 = vor.u32 %v910_v48, %v689_v47  ;;  %v694_v57 = vor.u32 %v908_v49, %v691_v51 }
   0xe   :  { %275 = vmatpush.bf16.msra.mxu3 %v734_v38  ;;  %v699_v55 = vld [vmem:[%s1324_s1 + $0x78] sm:$0xf0]  ;;  %v698_v58 = vor.u32 %v911_v53, %v697_v52  ;;  %v673_v59 = vld [vmem:[%s1324_s1 + $0x40] sm:$0xf]  ;;  %v906_v60 = vld [vmem:[%s1324_s1 + $0x4c] sm:$0xf0] }
   0xf   :  { %v904_v61 = vld [vmem:[%s1324_s1 + $0x44] sm:$0xf]  ;;  %v702_v62 = vor.u32 %v909_v54, %v699_v55  ;;  %v675_v63 = vld [vmem:[%s1324_s1 + $0x50] sm:$0xf0]  ;;  %v681_v0 = vld [vmem:[%s1324_s1 + $0x48] sm:$0xf]  ;;  %v674_v4 = vor.u32 %v906_v60, %v673_v59 }
  0x10   :  { %234 = vmatpush.bf16.msra.mxu0 %v706_v44  ;;  %v907_v1 = vld [vmem:[%s1324_s1 + $0x54] sm:$0xf0]  ;;  %v905_v2 = vld [vmem:[%s1324_s1 + $0x4c] sm:$0xf]  ;;  %v683_v3 = vld [vmem:[%s1324_s1 + $0x58] sm:$0xf0]  ;;  %v678_v5 = vor.u32 %v904_v61, %v675_v63 }
  0x11   :  { %248 = vmatpush.bf16.msra.mxu1 %v710_v45  ;;  %262 = vmatpush.bf16.msra.mxu2 %v714_v46  ;;  %v682_v6 = vor.u32 %v907_v1, %v681_v0  ;;  %v657_v7 = vld [vmem:[%s1324_s1 + $0x20] sm:$0xf]  ;;  %v902_v8 = vld [vmem:[%s1324_s1 + $0x2c] sm:$0xf0]  ;;  %v900_v9 = vld [vmem:[%s1324_s1 + $0x24] sm:$0xf]  ;;  %v686_v10 = vor.u32 %v905_v2, %v683_v3 }
  0x12   :  { %276 = vmatpush.bf16.msra.mxu3 %v718_v50  ;;  %v659_v11 = vld [vmem:[%s1324_s1 + $0x30] sm:$0xf0]  ;;  %v665_v12 = vld [vmem:[%s1324_s1 + $0x28] sm:$0xf]  ;;  %v903_v13 = vld [vmem:[%s1324_s1 + $0x34] sm:$0xf0]  ;;  %v658_v16 = vor.u32 %v902_v8, %v657_v7 }
  0x13   :  { %v901_v14 = vld [vmem:[%s1324_s1 + $0x2c] sm:$0xf]  ;;  %v667_v15 = vld [vmem:[%s1324_s1 + $0x38] sm:$0xf0]  ;;  %v662_v17 = vor.u32 %v900_v9, %v659_v11  ;;  %v666_v18 = vor.u32 %v903_v13, %v665_v12  ;;  %v641_v19 = vld [vmem:[%s1324_s1] sm:$0xf] }
  0x14   :  { %235 = vmatpush.bf16.msra.mxu0 %v690_v56  ;;  %v898_v20 = vld [vmem:[%s1324_s1 + $0xc] sm:$0xf0]  ;;  %v896_v21 = vld [vmem:[%s1324_s1 + $0x4] sm:$0xf]  ;;  %v670_v22 = vor.u32 %v901_v14, %v667_v15  ;;  %v643_v23 = vld [vmem:[%s1324_s1 + $0x10] sm:$0xf0] }
  0x15   :  { %249 = vmatpush.bf16.msra.mxu1 %v694_v57  ;;  %263 = vmatpush.bf16.msra.mxu2 %v698_v58  ;;  %v649_v24 = vld [vmem:[%s1324_s1 + $0x8] sm:$0xf]  ;;  %v899_v25 = vld [vmem:[%s1324_s1 + $0x14] sm:$0xf0]  ;;  %v897_v26 = vld [vmem:[%s1324_s1 + $0xc] sm:$0xf]  ;;  %v642_v28 = vor.u32 %v898_v20, %v641_v19 }
  0x16   :  { %277 = vmatpush.bf16.msra.mxu3 %v702_v62  ;;  %v651_v27 = vld [vmem:[%s1324_s1 + $0x18] sm:$0xf0] }
  0x18   :  { %236 = vmatpush.bf16.msra.mxu0 %v674_v4 }
  0x19   :  { %250 = vmatpush.bf16.msra.mxu1 %v678_v5  ;;  %264 = vmatpush.bf16.msra.mxu2 %v682_v6 }
  0x1a   :  { %278 = vmatpush.bf16.msra.mxu3 %v686_v10 }
  0x1c   :  { %237 = vmatpush.bf16.msra.mxu0 %v658_v16 }
  0x1d   :  { %10 = vsyncpa [#allocation3], 0  ;;  %251 = vmatpush.bf16.msra.mxu1 %v662_v17  ;;  %265 = vmatpush.bf16.msra.mxu2 %v666_v18  ;;  %v646_v29 = vor.u32 %v896_v21, %v643_v23  ;;  %v650_v30 = vor.u32 %v899_v25, %v649_v24  ;;  %v654_v31 = vor.u32 %v897_v26, %v651_v27  ;;  %v935_v32 = vld [vmem:[%s1326_s3 + $0x38] sm:$0xff]  ;;  %v895_v33 = vld [vmem:[%s1323_s0] sm:$0xff]  ;;  %s990_s8 = smov [#allocation2]   ;;  %s623_s12 = sshll.u32 %s1328_s5, 4  ;;  %s624_s12 = int_to_ptr.hbm [resolvable:$true] %s623_s12 }
  0x1e   :  { %279 = vmatpush.bf16.msra.mxu3 %v670_v22  ;;  %v943_v34 = vld [vmem:[%s1326_s3 + $0x78] sm:$0xff]  ;;  %v934_v36 = vld [vmem:[%s1326_s3 + $0x30] sm:$0xff]  ;;  %v933_v40 = vld [vmem:[%s1326_s3 + $0x28] sm:$0xff]  ;;  %s621_s9 = sshll.u32 %s990_s8, 4  ;;  %s992_s13 = smov 8   ;;  %s622_s9 = int_to_ptr.vmem [resolvable:$true] %s621_s9 }
  0x1f   :  { %v951_v35 = vld [vmem:[%s1326_s3 + $0xb8] sm:$0xff]  ;;  %v942_v38 = vld [vmem:[%s1326_s3 + $0x70] sm:$0xff]  ;;  %v941_v42 = vld [vmem:[%s1326_s3 + $0x68] sm:$0xff] }
  0x20   :  { %238 = vmatpush.bf16.msra.mxu0 %v642_v28  ;;  %v959_v37 = vld [vmem:[%s1326_s3 + $0xf8] sm:$0xff]  ;;  %v950_v39 = vld [vmem:[%s1326_s3 + $0xb0] sm:$0xff]  ;;  %v949_v43 = vld [vmem:[%s1326_s3 + $0xa8] sm:$0xff] }
  0x21   :  { %252 = vmatpush.bf16.msra.mxu1 %v646_v29  ;;  %266 = vmatpush.bf16.msra.mxu2 %v650_v30  ;;  %v958_v41 = vld [vmem:[%s1326_s3 + $0xf0] sm:$0xff]  ;;  %v932_v44 = vld [vmem:[%s1326_s3 + $0x20] sm:$0xff]  ;;  %v957_v45 = vld [vmem:[%s1326_s3 + $0xe8] sm:$0xff] }
  0x22   :  { %280 = vmatpush.bf16.msra.mxu3 %v654_v31  ;;  %v940_v46 = vld [vmem:[%s1326_s3 + $0x60] sm:$0xff]  ;;  %v931_v47 = vld [vmem:[%s1326_s3 + $0x18] sm:$0xff]  ;;  %v930_v51 = vld [vmem:[%s1326_s3 + $0x10] sm:$0xff] }
  0x23   :  { %239 = vmatmul.bf16.vlgmr.msra.gmra.mxu0 %v895_v33  ;;  %v939_v48 = vld [vmem:[%s1326_s3 + $0x58] sm:$0xff]  ;;  %v948_v49 = vld [vmem:[%s1326_s3 + $0xa0] sm:$0xff]  ;;  %v938_v52 = vld [vmem:[%s1326_s3 + $0x50] sm:$0xff] }
  0x24   :  { %559 = vmatpush.bf16.msrb.mxu0 %v935_v32  ;;  %253 = vmatmul.bf16.vlgmr.msra.gmra.mxu1 %v895_v33  ;;  %v956_v50 = vld [vmem:[%s1326_s3 + $0xe0] sm:$0xff]  ;;  %v947_v53 = vld [vmem:[%s1326_s3 + $0x98] sm:$0xff]  ;;  %v929_v55 = vld [vmem:[%s1326_s3 + $0x8] sm:$0xff] }
  0x25   :  { %573 = vmatpush.bf16.msrb.mxu1 %v943_v34  ;;  %267 = vmatmul.bf16.vlgmr.msra.gmra.mxu2 %v895_v33  ;;  %v955_v54 = vld [vmem:[%s1326_s3 + $0xd8] sm:$0xff]  ;;  %v937_v56 = vld [vmem:[%s1326_s3 + $0x48] sm:$0xff]  ;;  %v946_v57 = vld [vmem:[%s1326_s3 + $0x90] sm:$0xff] }
  0x26   :  { %281 = vmatmul.bf16.vlgmr.msra.gmra.mxu3 %v895_v33  ;;  %587 = vmatpush.bf16.msrb.mxu2 %v951_v35  ;;  %v954_v58 = vld [vmem:[%s1326_s3 + $0xd0] sm:$0xff]  ;;  %v928_v59 = vld [vmem:[%s1326_s3] sm:$0xff]  ;;  %v945_v61 = vld [vmem:[%s1326_s3 + $0x88] sm:$0xff] }
  0x27   :  { %601 = vmatpush.bf16.msrb.mxu3 %v959_v37  ;;  %v936_v60 = vld [vmem:[%s1326_s3 + $0x40] sm:$0xff]  ;;  %v953_v62 = vld [vmem:[%s1326_s3 + $0xc8] sm:$0xff] }
  0x28   :  { %560 = vmatpush.bf16.msrb.mxu0 %v934_v36  ;;  %v944_v63 = vld [vmem:[%s1326_s3 + $0x80] sm:$0xff] }
  0x29   :  { %574 = vmatpush.bf16.msrb.mxu1 %v942_v38  ;;  %v952_v0 = vld [vmem:[%s1326_s3 + $0xc0] sm:$0xff] }
  0x2a   :  { %588 = vmatpush.bf16.msrb.mxu2 %v950_v39  ;;  %v55_v1 = vld [vmem:[%s1325_s2] sm:$0xf] }
  0x2b   :  { %602 = vmatpush.bf16.msrb.mxu3 %v958_v41  ;;  %v57_v3 = vperm.slane %v55_v1, 0  ;;  %v58_v5 = vperm.slane %v55_v1, 1  ;;  %v59_v15 = vperm.slane %v55_v1, 2  ;;  %v60_v17 = vperm.slane %v55_v1, 3  ;;  %v963_v35 = vld [vmem:[%s1327_s4] ss:$0 sm:$0xff] }
  0x2c   :  { %561 = vmatpush.bf16.msrb.mxu0 %v933_v40  ;;  %s991_s4 = smov 128  }
  0x2d   :  { %575 = vmatpush.bf16.msrb.mxu1 %v941_v42 }
  0x2e   :  { %589 = vmatpush.bf16.msrb.mxu2 %v949_v43 }
  0x2f   :  { %603 = vmatpush.bf16.msrb.mxu3 %v957_v45 }
  0x30   :  { %562 = vmatpush.bf16.msrb.mxu0 %v932_v44 }
  0x31   :  { %576 = vmatpush.bf16.msrb.mxu1 %v940_v46 }
  0x32   :  { %590 = vmatpush.bf16.msrb.mxu2 %v948_v49 }
  0x33   :  { %604 = vmatpush.bf16.msrb.mxu3 %v956_v50 }
  0x34   :  { %563 = vmatpush.bf16.msrb.mxu0 %v931_v47 }
  0x35   :  { %577 = vmatpush.bf16.msrb.mxu1 %v939_v48 }
  0x36   :  { %591 = vmatpush.bf16.msrb.mxu2 %v947_v53 }
  0x37   :  { %605 = vmatpush.bf16.msrb.mxu3 %v955_v54 }
  0x38   :  { %564 = vmatpush.bf16.msrb.mxu0 %v930_v51 }
  0x39   :  { %578 = vmatpush.bf16.msrb.mxu1 %v938_v52 }
  0x3a   :  { %592 = vmatpush.bf16.msrb.mxu2 %v946_v57 }
  0x3b   :  { %606 = vmatpush.bf16.msrb.mxu3 %v954_v58 }
  0x3c   :  { %565 = vmatpush.bf16.msrb.mxu0 %v929_v55 }
  0x3d   :  { %579 = vmatpush.bf16.msrb.mxu1 %v937_v56 }
  0x3e   :  { %593 = vmatpush.bf16.msrb.mxu2 %v945_v61 }
  0x3f   :  { %607 = vmatpush.bf16.msrb.mxu3 %v953_v62 }
  0x40   :  { %566 = vmatpush.bf16.msrb.mxu0 %v928_v59 }
  0x41   :  { %580 = vmatpush.bf16.msrb.mxu1 %v936_v60 }
  0x42   :  { %594 = vmatpush.bf16.msrb.mxu2 %v944_v63 }
  0x43   :  { %608 = vmatpush.bf16.msrb.mxu3 %v952_v0 }
  0xa0   :  { %v240_v2 = vpop.f32.mrf.mxu0 }
  0xa1   :  { %v254_v4 = vpop.f32.mrf.mxu1  ;;  %v241_v6 = vadd.f32 %v240_v2, %v57_v3 }
  0xa2   :  { %v255_v7 = vadd.f32 %v254_v4, %v58_v5 }
  0xa3   :  { %v287_v11 = vmax.f32 %v241_v6, 0.0 }
  0xa4   :  { %v288_v14 = vmax.f32 %v255_v7, 0.0 }
  0xa8   :  { %v268_v8 = vpop.f32.mrf.mxu2  ;;  %v242_v10 = vpop.f32.mrf.mxu0 }
  0xa9   :  { %v282_v9 = vpop.f32.mrf.mxu3  ;;  %v243_v12 = vadd.f32 %v242_v10, %v57_v3  ;;  %v256_v13 = vpop.f32.mrf.mxu1  ;;  %v269_v21 = vadd.f32 %v268_v8, %v59_v15 }
  0xaa   :  { %v257_v16 = vadd.f32 %v256_v13, %v58_v5  ;;  %v283_v23 = vadd.f32 %v282_v9, %v60_v17 }
  0xab   :  { %v291_v18 = vmax.f32 %v243_v12, 0.0  ;;  %v289_v28 = vmax.f32 %v269_v21, 0.0 }
  0xac   :  { %v292_v19 = vmax.f32 %v257_v16, 0.0  ;;  %v290_v30 = vmax.f32 %v283_v23, 0.0 }
  0xad   :  { %v295_v20 = vpack.c.bf16 %v291_v18, %v287_v11 }
  0xae   :  { %v296_v22 = vpack.c.bf16 %v292_v19, %v288_v14 }
  0xaf   :  { %567 = vmatmul.bf16.vlgmr.msrb.gmra.mxu0 %v295_v20 }
  0xb0   :  { %v270_v24 = vpop.f32.mrf.mxu2  ;;  %581 = vmatmul.bf16.vlgmr.msrb.gmra.mxu1 %v296_v22 }
  0xb1   :  { %v271_v25 = vadd.f32 %v270_v24, %v59_v15  ;;  %v284_v26 = vpop.f32.mrf.mxu3 }
  0xb2   :  { %v285_v27 = vadd.f32 %v284_v26, %v60_v17 }
  0xb3   :  { %v293_v29 = vmax.f32 %v271_v25, 0.0 }
  0xb4   :  { %v294_v31 = vmax.f32 %v285_v27, 0.0 }
  0xb5   :  { %v297_v32 = vpack.c.bf16 %v293_v29, %v289_v28 }
  0xb6   :  { %v298_v33 = vpack.c.bf16 %v294_v31, %v290_v30 }
  0xb7   :  { %595 = vmatmul.bf16.vlgmr.msrb.gmra.mxu2 %v297_v32 }
  0xb8   :  { %609 = vmatmul.bf16.vlgmr.msrb.gmra.mxu3 %v298_v33 }
 0x12c   :  { %v568_v34 = vpop.f32.mrf.mxu0 }
 0x12d   :  { %v569_v36 = vadd.f32 %v963_v35, %v568_v34  ;;  %v582_v37 = vpop.f32.mrf.mxu1 }
 0x12f   :  { %v583_v38 = vadd.f32 %v582_v37, %v569_v36 }
 0x134   :  { %v570_v39 = vpop.f32.mrf.mxu0 }
 0x135   :  { %v571_v43 = vadd.f32 %v963_v35, %v570_v39  ;;  %v584_v45 = vpop.f32.mrf.mxu1 }
 0x137   :  { %v585_v46 = vadd.f32 %v584_v45, %v571_v43 }
 0x13a   :  { %v596_v40 = vpop.f32.mrf.mxu2 }
 0x13b   :  { %v597_v41 = vadd.f32 %v596_v40, %v583_v38  ;;  %v610_v42 = vpop.f32.mrf.mxu3 }
 0x13d   :  { %v611_v44 = vadd.f32 %v610_v42, %v597_v41 }
 0x13f   :  { %615 = vst [vmem:[#allocation2] sm:$0xff] %v611_v44 }
 0x142   :  { %v598_v47 = vpop.f32.mrf.mxu2 }
 0x143   :  { %v599_v48 = vadd.f32 %v598_v47, %v585_v46  ;;  %v612_v49 = vpop.f32.mrf.mxu3 }
 0x145   :  { %v613_v50 = vadd.f32 %v612_v49, %v599_v48 }
 0x147   :  { %616 = vst [vmem:[#allocation2 + $0x8] sm:$0xff] %v613_v50 }
 0x148   :  { %629 = dma.vmem_to_hbm [thread:$0]  %s622_s9, 256, %s624_s12, [#allocation3], %s991_s4, %s991_s4, %s992_s13  }
 0x149   :  { %988 = dma.done.wait [#allocation3], 256  }
 0x14a   :  { %989 = vsyncadd [#allocation3], 4294967040 }
 0x14b   :  { %634 = vsyncpa [#allocation3], 1 }

</bundles_post_ra>
